<compile_context>
chip_gen: v5e
topology: v5e:2x2
jax: 0.10.0
libtpu: 0.0.40
codegen_flags: <defaults>
</compile_context>

<pallas_src>
import jax
import jax.numpy as jnp
from jax import lax
from jax.experimental import pallas as pl
from jax.experimental.pallas import tpu as pltpu


def _lora_linear_kernel(x_ref, w_ref, b_ref, xa_ref, lb_ref, o_ref, acc_ref):
    """One (tm, tn) output tile; accumulates the base matmul over the K axis."""
    k = pl.program_id(2)
    nt = (((1,), (1,)), ((), ()))  # contract last dims of both operands (NT matmul)

    @pl.when(k == 0)
    def _init():
        acc_ref[...] = jnp.zeros_like(acc_ref)

    # Base path partial: x_tile (tm, tk) @ W_tile^T (W tile is (tn, tk)).
    acc_ref[...] += lax.dot_general(x_ref[...], w_ref[...], nt,
                                    preferred_element_type=jnp.float32)

    @pl.when(k == pl.num_programs(2) - 1)
    def _finalize():
        # LoRA up-projection of the pre-scaled (tm, rank) intermediate with the
        # (tn, rank) B tile; done once per output tile.
        lora = lax.dot_general(xa_ref[...], lb_ref[...], nt,
                               preferred_element_type=jnp.float32)
        # TODO(synk): nn.Dropout on the LoRA branch omitted (identity in eval mode).
        o_ref[...] = (acc_ref[...] + lora + b_ref[...]).astype(o_ref.dtype)


def _round_up(x, m):
    return (x + m - 1) // m * m


def lora_linear_forward(x, weight, bias, lora_A, lora_B, *, alpha=32.0,
                        block_m=512, block_n=512, block_k=1024,
                        operand_dtype=jnp.bfloat16,
                        w_buffer_count=None,
                        vmem_limit_bytes=None):
    """LoRALinear forward.

    x:       (..., in_features)
    weight:  (out_features, in_features)   -- base nn.Linear weight (native layout)
    bias:    (out_features,)
    lora_A:  (rank, in_features)
    lora_B:  (out_features, rank)

    Tuning notes:
      * operand_dtype=bf16 is the default (MXU peak, half HBM/VMEM); pass
        jnp.float32 to keep full operand precision.  Accumulation is f32 either way.
      * v6e: tn multiples of 256, can grow to tn=1024/tk=2048 with
        vmem_limit_bytes ~ 64<<20.  v7x: keep working set < ~48 MiB (64 MiB/TC).
        v5e: prefer larger block_k (1024-2048) over block_n.
      * w_buffer_count=3 deepens W pipelining for small-M (decode) shapes where
        compute per step cannot hide the W DMA; sweep 2 vs 3.
      * For production layers whose dims are NOT multiples of the tile sizes,
        hoist the weight/bias/lora_B padding + dtype cast below to model-load
        time: per-call jnp.pad of W materializes a full HBM copy of the weight.
    """
    out_features, in_features = weight.shape
    rank = lora_A.shape[0]
    scaling = alpha / rank
    out_dtype = x.dtype

    orig_shape = x.shape
    x2d = x.reshape(-1, in_features).astype(operand_dtype)
    M = x2d.shape[0]

    # Tile sizes: sublane dim multiple of 8, lane dims multiple of 128,
    # clamped to the (padded) problem size.
    tm = min(block_m, _round_up(M, 8))
    m_pad = _round_up(M, tm)
    n128 = _round_up(out_features, 128)
    tn = min(block_n, n128)
    # Megacore: when there is only one M block (e.g. decode), make sure N splits
    # into >= 2 blocks so a "parallel" grid axis can feed both v7x TensorCores.
    if m_pad == tm and n128 >= 256:
        tn = min(tn, _round_up(n128 // 2, 128))
    n_pad = _round_up(out_features, tn)
    tk = min(block_k, _round_up(in_features, 128))
    k_pad = _round_up(in_features, tk)

    # Hoisted LoRA down-projection: tiny (M, rank) matmul in XLA, pre-scaled.
    nt = (((1,), (1,)), ((), ()))
    xa = lax.dot_general(x2d, lora_A.astype(operand_dtype), nt,
                         preferred_element_type=jnp.float32) * scaling
    xa_p = jnp.pad(xa.astype(operand_dtype), ((0, m_pad - M), (0, 0)))

    # Per-call padding of the activation; parameter padding below is width-0
    # (no-op) for tile-aligned layers -- hoist it to load time otherwise.
    x_p = jnp.pad(x2d, ((0, m_pad - M), (0, k_pad - in_features)))
    w_p = jnp.pad(weight.astype(operand_dtype),
                  ((0, n_pad - out_features), (0, k_pad - in_features)))
    lb_p = jnp.pad(lora_B.astype(operand_dtype), ((0, n_pad - out_features), (0, 0)))
    bias_p = jnp.pad(bias.astype(jnp.float32),
                     (0, n_pad - out_features)).reshape(1, n_pad)

    grid = (m_pad // tm, n_pad // tn, k_pad // tk)

    # Optional deeper pipelining on the dominant W stream (decode shapes).
    w_spec_kwargs = {}
    if w_buffer_count is not None:
        w_spec_kwargs["pipeline_mode"] = pl.Buffered(w_buffer_count)
    w_spec = pl.BlockSpec((tn, tk), lambda i, j, k: (j, k), **w_spec_kwargs)

    # Advisory cost estimate reflecting the actual streamed traffic:
    # x is re-streamed once per N-tile column, W / B / bias once per M-tile row.
    x_streams = n_pad // tn
    w_streams = m_pad // tm
    cost = pl.CostEstimate(
        flops=2 * M * in_features * out_features + 2 * M * rank * out_features,
        transcendentals=0,
        bytes_accessed=(
            x_p.size * x_p.dtype.itemsize * x_streams
            + w_p.size * w_p.dtype.itemsize * w_streams
            + lb_p.size * lb_p.dtype.itemsize * w_streams
            + bias_p.size * bias_p.dtype.itemsize * w_streams
            + xa_p.size * xa_p.dtype.itemsize
            + m_pad * n_pad * jnp.dtype(out_dtype).itemsize
        ),
    )

    out2d = pl.pallas_call(
        _lora_linear_kernel,
        out_shape=jax.ShapeDtypeStruct((m_pad, n_pad), out_dtype),
        grid_spec=pltpu.PrefetchScalarGridSpec(
            num_scalar_prefetch=0,
            grid=grid,
            in_specs=[
                pl.BlockSpec((tm, tk), lambda i, j, k: (i, k)),     # x tile
                w_spec,                                             # W (out,in) tile
                pl.BlockSpec((1, tn), lambda i, j, k: (0, j)),      # bias tile (f32)
                pl.BlockSpec((tm, rank), lambda i, j, k: (i, 0)),   # xa = scaled x@A^T
                pl.BlockSpec((tn, rank), lambda i, j, k: (j, 0)),   # lora_B tile
            ],
            out_specs=pl.BlockSpec((tm, tn), lambda i, j, k: (i, j)),
            scratch_shapes=[
                pltpu.VMEM((tm, tn), jnp.float32),   # base-path f32 accumulator
            ],
        ),
        compiler_params=pltpu.CompilerParams(
            dimension_semantics=("parallel", "parallel", "arbitrary"),
            vmem_limit_bytes=vmem_limit_bytes,
        ),
        cost_estimate=cost,
    )(x_p, w_p, bias_p, xa_p, lb_p)

    out2d = out2d[:M, :out_features]
    return out2d.reshape(*orig_shape[:-1], out_features)


if __name__ == "__main__":
    key = jax.random.PRNGKey(0)
    k_x, k_w, k_b, k_a, k_lb = jax.random.split(key, 5)

    batch, seq = 2, 8
    in_features, out_features, rank = 256, 256, 16
    alpha = 32.0
    scaling = alpha / rank

    x = jax.random.normal(k_x, (batch, seq, in_features), dtype=jnp.float32)

    # Deterministic synthetic parameters (shapes match the module's __init__).
    weight = jax.random.normal(k_w, (out_features, in_features), jnp.float32) * 0.05
    bias = jax.random.normal(k_b, (out_features,), jnp.float32) * 0.01
    # lora_A ~ kaiming-uniform-style init; lora_B nonzero here so the LoRA path
    # is exercised (the PyTorch __init__ zeros lora_B, which would hide bugs).
    bound = 1.0 / jnp.sqrt(in_features)
    lora_A = jax.random.uniform(k_a, (rank, in_features), dtype=jnp.float32,
                                minval=-bound, maxval=bound)
    lora_B = jax.random.normal(k_lb, (out_features, rank), jnp.float32) * 0.02

    # 1) Production-default tiles (single K block; exercises the decode-time
    #    "split N for megacore" path since M fits one tile).
    out_big = lora_linear_forward(x, weight, bias, lora_A, lora_B, alpha=alpha)
    # 2) Tiny tiles so this small test exercises the full M/N/K grid (2,2,2),
    #    including accumulator init / finalize across multiple K steps.
    out_small = lora_linear_forward(x, weight, bias, lora_A, lora_B, alpha=alpha,
                                    block_m=8, block_n=128, block_k=128)
    out_big, out_small = jax.block_until_ready((out_big, out_small))

    # Reference mirroring the kernel's numerics (bf16 operands, f32 accumulation).
    hp = jax.lax.Precision.HIGHEST
    c = lambda t: t.astype(jnp.bfloat16).astype(jnp.float32)
    xa_ref = c(jnp.matmul(c(x), c(lora_A).T, precision=hp) * scaling)
    ref_bf16 = (jnp.matmul(c(x), c(weight).T, precision=hp) + bias
                + jnp.matmul(xa_ref, c(lora_B).T, precision=hp))
    # Full-f32 reference (module semantics; looser tolerance for bf16 operands).
    ref_f32 = (jnp.matmul(x, weight.T, precision=hp) + bias
               + scaling * jnp.matmul(jnp.matmul(x, lora_A.T, precision=hp),
                                      lora_B.T, precision=hp))

    for out in (out_big, out_small):
        assert out.shape == (batch, seq, out_features)
        assert jnp.allclose(out, ref_bf16, atol=2e-3, rtol=2e-3), \
            "mismatch vs bf16-operand reference"
        assert jnp.allclose(out, ref_f32, atol=5e-2, rtol=5e-2), \
            "mismatch vs f32 reference"

    print("KERNEL_OK")
</pallas_src>

<mosaic_0001>
module attributes {stable_mosaic.version = 11 : i64} {
  func.func @_lora_linear_kernel(%arg0: i32, %arg1: i32, %arg2: i32, %arg3: memref<16x256xbf16, #tpu.memory_space<vmem>>, %arg4: memref<128x256xbf16, #tpu.memory_space<vmem>>, %arg5: memref<1x128xf32, #tpu.memory_space<vmem>>, %arg6: memref<16x16xbf16, #tpu.memory_space<vmem>>, %arg7: memref<128x16xbf16, #tpu.memory_space<vmem>>, %arg8: memref<16x128xf32, #tpu.memory_space<vmem>>, %arg9: memref<16x128xf32, #tpu.memory_space<vmem>>) attributes {dimension_semantics = [#tpu.dimension_semantics<parallel>, #tpu.dimension_semantics<parallel>, #tpu.dimension_semantics<arbitrary>], iteration_bounds = array<i64: 1, 2, 1>, scalar_prefetch = 0 : i64, scratch_operands = 1 : i64, tpu.core_type = #tpu.core_type<tc>, window_params = [{transform_indices = @transform_0, window_bounds = array<i64: 16, 256>}, {transform_indices = @transform_1, window_bounds = array<i64: 128, 256>}, {transform_indices = @transform_2, window_bounds = array<i64: 1, 128>}, {transform_indices = @transform_3, window_bounds = array<i64: 16, 16>}, {transform_indices = @transform_4, window_bounds = array<i64: 128, 16>}, {transform_indices = @transform_5, window_bounds = array<i64: 16, 128>}]} {
    %c0_i32 = arith.constant 0 : i32
    %0 = arith.cmpi eq, %arg2, %c0_i32 : i32
    %1 = arith.extui %0 : i1 to i32
    %c0_i32_0 = arith.constant 0 : i32
    %2 = arith.cmpi ne, %1, %c0_i32_0 : i32
    scf.if %2 {
      %cst_10 = arith.constant 0.000000e+00 : f32
      %12 = vector.broadcast %cst_10 : f32 to vector<16x128xf32>
      %c0_11 = arith.constant 0 : index
      %c0_12 = arith.constant 0 : index
      %13 = vector.load %arg9[%c0_11, %c0_12] : memref<16x128xf32, #tpu.memory_space<vmem>>, vector<16x128xf32>
      tpu.vector_store %arg9[%c0_11, %c0_12], %12 {strides = array<i32>} : memref<16x128xf32, #tpu.memory_space<vmem>>, vector<16x128xf32>,
    } else {
    }
    %c0 = arith.constant 0 : index
    %c0_1 = arith.constant 0 : index
    %3 = vector.load %arg9[%c0, %c0_1] : memref<16x128xf32, #tpu.memory_space<vmem>>, vector<16x128xf32>
    %c0_2 = arith.constant 0 : index
    %c0_3 = arith.constant 0 : index
    %4 = vector.load %arg3[%c0_2, %c0_3] : memref<16x256xbf16, #tpu.memory_space<vmem>>, vector<16x256xbf16>
    %c0_4 = arith.constant 0 : index
    %c0_5 = arith.constant 0 : index
    %5 = vector.load %arg4[%c0_4, %c0_5] : memref<128x256xbf16, #tpu.memory_space<vmem>>, vector<128x256xbf16>
    %cst = arith.constant dense<0.000000e+00> : vector<16x128xf32>
    %6 = tpu.matmul %4, %5, %cst {dimension_numbers = #tpu.dot_dimension_numbers<[1], [1], [0], [0], [0, 0, 1, 0], [], []>} : vector<16x256xbf16>, vector<128x256xbf16>, vector<16x128xf32> -> vector<16x128xf32>
    %7 = arith.addf %3, %6 : vector<16x128xf32>
    %c0_6 = arith.constant 0 : index
    %c0_7 = arith.constant 0 : index
    %8 = vector.load %arg9[%c0_6, %c0_7] : memref<16x128xf32, #tpu.memory_space<vmem>>, vector<16x128xf32>
    tpu.vector_store %arg9[%c0_6, %c0_7], %7 {strides = array<i32>} : memref<16x128xf32, #tpu.memory_space<vmem>>, vector<16x128xf32>,
    %c0_i32_8 = arith.constant 0 : i32
    %9 = arith.cmpi eq, %arg2, %c0_i32_8 : i32
    %10 = arith.extui %9 : i1 to i32
    %c0_i32_9 = arith.constant 0 : i32
    %11 = arith.cmpi ne, %10, %c0_i32_9 : i32
    scf.if %11 {
      %c0_10 = arith.constant 0 : index
      %c0_11 = arith.constant 0 : index
      %12 = vector.load %arg6[%c0_10, %c0_11] : memref<16x16xbf16, #tpu.memory_space<vmem>>, vector<16x16xbf16>
      %c0_12 = arith.constant 0 : index
      %c0_13 = arith.constant 0 : index
      %13 = vector.load %arg7[%c0_12, %c0_13] : memref<128x16xbf16, #tpu.memory_space<vmem>>, vector<128x16xbf16>
      %cst_14 = arith.constant dense<0.000000e+00> : vector<16x128xf32>
      %14 = tpu.matmul %12, %13, %cst_14 {dimension_numbers = #tpu.dot_dimension_numbers<[1], [1], [0], [0], [0, 0, 1, 0], [], []>} : vector<16x16xbf16>, vector<128x16xbf16>, vector<16x128xf32> -> vector<16x128xf32>
      %c0_15 = arith.constant 0 : index
      %c0_16 = arith.constant 0 : index
      %15 = vector.load %arg9[%c0_15, %c0_16] : memref<16x128xf32, #tpu.memory_space<vmem>>, vector<16x128xf32>
      %16 = arith.addf %15, %14 : vector<16x128xf32>
      %c0_17 = arith.constant 0 : index
      %c0_18 = arith.constant 0 : index
      %17 = vector.load %arg5[%c0_17, %c0_18] : memref<1x128xf32, #tpu.memory_space<vmem>>, vector<1x128xf32>
      %18 = vector.broadcast %17 : vector<1x128xf32> to vector<16x128xf32>
      %19 = arith.addf %16, %18 : vector<16x128xf32>
      %c0_19 = arith.constant 0 : index
      %c0_20 = arith.constant 0 : index
      %20 = vector.load %arg8[%c0_19, %c0_20] : memref<16x128xf32, #tpu.memory_space<vmem>>, vector<16x128xf32>
      tpu.vector_store %arg8[%c0_19, %c0_20], %19 {strides = array<i32>} : memref<16x128xf32, #tpu.memory_space<vmem>>, vector<16x128xf32>,
    } else {
    }
    return
  }
  func.func @transform_0(%arg0: i32, %arg1: i32, %arg2: i32) -> (i32, i32) {
    %c0_i32 = arith.constant 0 : i32
    return %arg0, %arg2 : i32, i32
  }
  func.func @transform_1(%arg0: i32, %arg1: i32, %arg2: i32) -> (i32, i32) {
    %c0_i32 = arith.constant 0 : i32
    return %arg1, %arg2 : i32, i32
  }
  func.func @transform_2(%arg0: i32, %arg1: i32, %arg2: i32) -> (i32, i32) {
    %c0_i32 = arith.constant 0 : i32
    %c0_i32_0 = arith.constant 0 : i32
    return %c0_i32, %arg1 : i32, i32
  }
  func.func @transform_3(%arg0: i32, %arg1: i32, %arg2: i32) -> (i32, i32) {
    %c0_i32 = arith.constant 0 : i32
    %c0_i32_0 = arith.constant 0 : i32
    return %arg0, %c0_i32 : i32, i32
  }
  func.func @transform_4(%arg0: i32, %arg1: i32, %arg2: i32) -> (i32, i32) {
    %c0_i32 = arith.constant 0 : i32
    %c0_i32_0 = arith.constant 0 : i32
    return %arg1, %c0_i32 : i32, i32
  }
  func.func @transform_5(%arg0: i32, %arg1: i32, %arg2: i32) -> (i32, i32) {
    %c0_i32 = arith.constant 0 : i32
    return %arg0, %arg1 : i32, i32
  }
}

</mosaic_0001>

<bundles_post_ra>
// kernel: tpu_custom_call.1
= control target key start
LH: loop header
LB: loop body
LE: loop exit
PB: predicated region body
PF: predicated region fallthrough
CT: control target
= control target key end

     0   :  { %10 = vsyncpa [#allocation4], 0  ;;  %s1377_s0 = inlined_call_operand.vmem [shape: bf16[16,256], index: 0, kind: input, shape index: {}]   ;;  %s1378_s1 = inlined_call_operand.hbm [shape: bf16[256,256], index: 1, kind: input, shape index: {}]   ;;  %s1379_s2 = inlined_call_operand.vmem [shape: f32[1,256], index: 2, kind: input, shape index: {}]   ;;  %s1380_s3 = inlined_call_operand.vmem [shape: bf16[16,16], index: 3, kind: input, shape index: {}]   ;;  %s1381_s4 = inlined_call_operand.vmem [shape: bf16[256,16], index: 4, kind: input, shape index: {}]   ;;  %s1382_s5 = inlined_call_operand.hbm [shape: f32[16,256], index: 5, kind: output, shape index: {}]  }
   0x1   :  { %12 = vsyncpa [#allocation4 + $0x1], 0 }
   0x2   :  { %13 = vsyncpa [#allocation5], 0 }
   0x3   :  { %15 = vsyncpa [#allocation5 + $0x1], 0  ;;  %s1179_s18 = smov 0   ;;  %s1181_s19 = smov 0  }
   0x4   :  { %s1183_s20 = smov 0   ;;  %s1185_s21 = smov 0  }
   0x5   :  { %s1187_s22 = smov 0   ;;  %s1189_s23 = smov 0  }
   0x6 LB: > { %s805_s24 = sadd.s32 4294967295, %s1142_s23   ;;  %s806_s25 = sadd.s32 4294967294, %s1142_s23   ;;  %s1142_s23 = sphi %s1189_s23, %s21_s23   ;;  %s1138_s22 = sphi %s1187_s22, %s1391_s22   ;;  %s1134_s21 = sphi %s1185_s21, %s1390_s21   ;;  %s1130_s20 = sphi %s1183_s20, %s1389_s20   ;;  %s1126_s19 = sphi %s1181_s19, %s1388_s19   ;;  %s1122_s18 = sphi %s1179_s18, %s1387_s18  }
   0x7   : > { %s36_s26 = sadd.s32 1, %s1138_s22  ;;  %s77_s27 = sadd.s32 1, %s1130_s20 }
   0x8   : > { %p38_p0 = scmp.ge.s32.totalorder %s36_s26, 2  ;;  %p84_p1 = scmp.ne.s32.totalorder %s1130_s20, %s1126_s19 }
   0x9   : > { %p85_p2 = scmp.eq.s32.totalorder %s1142_s23, 0  ;;  %p90_p3 = scmp.ne.s32.totalorder %s1126_s19, %s1122_s18 }
   0xa   : > { %s1393_s26 = smov (%p38_p0, %s36_s26), 0  ;;  %p91_p5 = scmp.eq.s32.totalorder %s805_s24, 0 }
   0xb   : > { %p1220_p4 = por %p85_p2, %p84_p1  ;;  %s72_s29 = ssub.s32 %s1138_s22, %s1393_s26 }
   0xc   : > { %p194_p6 = scmp.eq.s32.totalorder %s805_s24, 1  ;;  %p75_p7 = scmp.eq.s32.totalorder %s72_s29, 0 }
   0xd   : > { %p1226_p8 = por %p91_p5, %p90_p3  ;;  %p200_p10 = scmp.eq.s32.totalorder %s806_s25, 1 }
   0xe   : > { %p1230_p9 = por %p194_p6, %p84_p1  ;;  %p810_p12 = scmp.ge.s32.totalorder %s1142_s23, 2 }
   0xf   : > { %s1235_s7 = scalar_select %p75_p7, %s1130_s20, %s77_s27  }
  0x10   : > { %p1237_p11 = por %p200_p10, %p90_p3  ;;  %p974_p13 = scmp.lt.s32.totalorder %s1142_s23, 2 }
  0x11   : > { %s244_s9 = sand.u32 1, %s1130_s20   ;;  %s934_s11 = sshll.u32 %s1138_s22, 7 }
  0x12   : > { %s811_s10 = sshll.u32 %s244_s9, 7  ;;  %s256_s14 = scalar_lea.hbm %s1378_s1, %s934_s11 }
  0x13   : > { %s248_s15 = scalar_lea.vmem [#allocation3], %s811_s10  ;;  %s257_s17 = sshll.u32 %s256_s14, 4  ;;  %s258_s17 = int_to_ptr.hbm [resolvable:$true] %s257_s17 }
  0x14   : > { %s259_s16 = sshll.u32 %s248_s15, 4  ;;  %p967_p0 = pnand %p974_p13, %p1220_p4  ;;  %s260_s16 = int_to_ptr.vmem [resolvable:$true] %s259_s16 }
  0x15   : > { %p815_p1 = scmp.ge.s32.totalorder %s1142_s23, 1  ;;  %s245_s24 = scalar_lea.sflag [#allocation4], %s244_s9 }
  0x16   : > { %s1144_s25 = smov 128   ;;  %s1145_s27 = smov 8  }
  0x17   : > { %969 = dma.hbm_to_vmem [thread:$0]  (!%p967_p0), %s258_s17, 2048, %s260_s16, %s245_s24, %s1144_s25, %s1144_s25, %s1145_s27  }
  0x18   : > { %p282_p2 = scmp.lt.s32.totalorder %s1142_s23, 3 }
  0x1a   : > { %p283_p3 = pnand %p815_p1, %p282_p2 }
  0x1b   : > { %s1253_s29 = sand.u32 (!%p283_p3), 1, %s1126_s19  }
  0x1c   : > { %286 = sbr.rel (%p283_p3) target bundleno = 254 (0xfe), region = 40  ;;  %s816_s10 = sshll.u32 (!%p283_p3), %s1253_s29, 7 }
  0x1d   : > { %s289_s11 = scalar_lea.sflag (!%p283_p3), [#allocation4], %s1253_s29  ;;  %s1257_s12 = scalar_lea.vmem (!%p283_p3), [#allocation3], %s816_s10 }
  0x21   : > { %1113 = dma.done.wait (%p1226_p8), %s289_s11, 2048  }
  0x22   : > { %1115 = vsyncadd (%p1226_p8), %s289_s11, 4294965248  ;;  %s818_s28 = sshll.u32 %s1134_s21, 4  ;;  %vm587_vm0 = vcmask 130048   ;;  %v886_v0 = vld [vmem:[%s1257_s12 + $0x70] sm:$0xf]  ;;  %p357_p5 = scmp.lt.s32.totalorder %s1134_s21, 1 }
  0x23   : > { %p367_p4 = scmp.lt.s32.totalorder %s818_s28, 31  ;;  %v952_v1 = vld [vmem:[%s1257_s12 + $0x74] sm:$0xf0]  ;;  %v951_v2 = vld [vmem:[%s1257_s12 + $0x74] sm:$0xf]  ;;  %s817_s30 = sshll.u32 %s1253_s29, 4 }
  0x24   : > { %v887_v3 = vor.u32 %v952_v1, %v886_v0  ;;  %v888_v4 = vld [vmem:[%s1257_s12 + $0x78] sm:$0xf0]  ;;  %v878_v8 = vld [vmem:[%s1257_s12 + $0x60] sm:$0xf]  ;;  %v950_v9 = vld [vmem:[%s1257_s12 + $0x64] sm:$0xf0] }
  0x25   : > { %s1395_s28 = smov (!%p367_p4, %s818_s28), 31  ;;  %v891_v6 = vor.u32 %v951_v2, %v888_v4  ;;  %v949_v10 = vld [vmem:[%s1257_s12 + $0x64] sm:$0xf]  ;;  %v880_v11 = vld [vmem:[%s1257_s12 + $0x68] sm:$0xf0]  ;;  %v879_v13 = vor.u32 %v950_v9, %v878_v8  ;;  %s930_s16 = sshll.u32 %s1134_s21, 3 }
  0x26   : > { %s819_s9 = sshll.u32 %s1395_s28, 2  ;;  %489 = vmatpush.bf16.xpose.msra.mxu0 %v887_v3  ;;  %v883_v14 = vor.u32 %v949_v10, %v880_v11  ;;  %v870_v16 = vld [vmem:[%s1257_s12 + $0x50] sm:$0xf]  ;;  %v948_v17 = vld [vmem:[%s1257_s12 + $0x54] sm:$0xf0]  ;;  %s655_s25 = scalar_lea.hbm %s1382_s5, %s930_s16 }
  0x27   : > { %s1267_s15 = scalar_lea.vmem %s1381_s4, %s819_s9  ;;  %503 = vmatpush.bf16.xpose.msra.mxu1 %v891_v6  ;;  %v947_v18 = vld [vmem:[%s1257_s12 + $0x54] sm:$0xf]  ;;  %v872_v19 = vld [vmem:[%s1257_s12 + $0x58] sm:$0xf0]  ;;  %v871_v21 = vor.u32 %v948_v17, %v870_v16  ;;  %v862_v24 = vld [vmem:[%s1257_s12 + $0x40] sm:$0xf] }
  0x28   : > { %v961_v5 = vld [vmem:[%s1267_s15 + $0x38] sm:$0xff]  ;;  %v960_v12 = vld [vmem:[%s1267_s15 + $0x30] sm:$0xff]  ;;  %v959_v20 = vld [vmem:[%s1267_s15 + $0x28] sm:$0xff]  ;;  %v875_v22 = vor.u32 %v947_v18, %v872_v19  ;;  %s358_s9 = scalar_select %p357_p5, %s1134_s21, 1 }
  0x29   : > { %v613_v7 = vsel %vm587_vm0, %v961_v5, 0  ;;  %v610_v15 = vsel %vm587_vm0, %v960_v12, 0  ;;  %v607_v23 = vsel %vm587_vm0, %v959_v20, 0  ;;  %v946_v25 = vld [vmem:[%s1257_s12 + $0x44] sm:$0xf0]  ;;  %v958_v28 = vld [vmem:[%s1267_s15 + $0x20] sm:$0xff] }
  0x2a   : > { %615 = vmatpush.bf16.xpose.msra.mxu2 %v613_v7  ;;  %v945_v26 = vld [vmem:[%s1257_s12 + $0x44] sm:$0xf]  ;;  %v864_v27 = vld [vmem:[%s1257_s12 + $0x48] sm:$0xf0]  ;;  %v863_v29 = vor.u32 %v946_v25, %v862_v24  ;;  %v604_v31 = vsel %vm587_vm0, %v958_v28, 0  ;;  %v957_v36 = vld [vmem:[%s1267_s15 + $0x18] sm:$0xff] }
  0x2b   : > { %v867_v30 = vor.u32 %v945_v26, %v864_v27  ;;  %v854_v32 = vld [vmem:[%s1257_s12 + $0x30] sm:$0xf]  ;;  %v944_v33 = vld [vmem:[%s1257_s12 + $0x34] sm:$0xf0]  ;;  %v943_v34 = vld [vmem:[%s1257_s12 + $0x34] sm:$0xf] }
  0x2c   : > { %v856_v35 = vld [vmem:[%s1257_s12 + $0x38] sm:$0xf0]  ;;  %v855_v37 = vor.u32 %v944_v33, %v854_v32  ;;  %v601_v39 = vsel %vm587_vm0, %v957_v36, 0  ;;  %v846_v40 = vld [vmem:[%s1257_s12 + $0x20] sm:$0xf]  ;;  %v956_v44 = vld [vmem:[%s1267_s15 + $0x10] sm:$0xff] }
  0x2d   : > { %v859_v38 = vor.u32 %v943_v34, %v856_v35  ;;  %v942_v41 = vld [vmem:[%s1257_s12 + $0x24] sm:$0xf0]  ;;  %v941_v42 = vld [vmem:[%s1257_s12 + $0x24] sm:$0xf]  ;;  %v848_v43 = vld [vmem:[%s1257_s12 + $0x28] sm:$0xf0] }
  0x2e   : > { %490 = vmatpush.bf16.xpose.msra.mxu0 %v879_v13  ;;  %v847_v45 = vor.u32 %v942_v41, %v846_v40  ;;  %v851_v46 = vor.u32 %v941_v42, %v848_v43  ;;  %v598_v47 = vsel %vm587_vm0, %v956_v44, 0  ;;  %v838_v48 = vld [vmem:[%s1257_s12 + $0x10] sm:$0xf]  ;;  %v940_v49 = vld [vmem:[%s1257_s12 + $0x14] sm:$0xf0]  ;;  %v955_v52 = vld [vmem:[%s1267_s15 + $0x8] sm:$0xff] }
  0x2f   : > { %504 = vmatpush.bf16.xpose.msra.mxu1 %v883_v14  ;;  %v939_v50 = vld [vmem:[%s1257_s12 + $0x14] sm:$0xf]  ;;  %v840_v51 = vld [vmem:[%s1257_s12 + $0x18] sm:$0xf0]  ;;  %v839_v53 = vor.u32 %v940_v49, %v838_v48  ;;  %v595_v55 = vsel %vm587_vm0, %v955_v52, 0  ;;  %v954_v60 = vld [vmem:[%s1267_s15] sm:$0xff]  ;;  %s359_s15 = scalar_lea.vmem %s1379_s2, %s358_s9 }
  0x30   : > { %v843_v54 = vor.u32 %v939_v50, %v840_v51  ;;  %v830_v56 = vld [vmem:[%s1257_s12] sm:$0xf]  ;;  %v938_v57 = vld [vmem:[%s1257_s12 + $0x4] sm:$0xf0]  ;;  %v937_v58 = vld [vmem:[%s1257_s12 + $0x4] sm:$0xf] }
  0x31   : > { %v832_v59 = vld [vmem:[%s1257_s12 + $0x8] sm:$0xf0]  ;;  %v831_v61 = vor.u32 %v938_v57, %v830_v56  ;;  %v592_v63 = vsel %vm587_vm0, %v954_v60, 0  ;;  %v822_v0 = vld [vmem:[%s1377_s0] sm:$0xf]  ;;  %s342_s27 = scalar_lea.vmem [#allocation6], %s817_s30 }
  0x32   : > { %616 = vmatpush.bf16.xpose.msra.mxu2 %v610_v15  ;;  %v835_v62 = vor.u32 %v937_v58, %v832_v59  ;;  %v936_v1 = vld [vmem:[%s1377_s0 + $0x4] sm:$0xf0]  ;;  %v935_v2 = vld [vmem:[%s1377_s0 + $0x4] sm:$0xf]  ;;  %v824_v3 = vld [vmem:[%s1377_s0 + $0x8] sm:$0xf0] }
  0x33   : > { %v823_v4 = vor.u32 %v936_v1, %v822_v0  ;;  %v827_v5 = vor.u32 %v935_v2, %v824_v3  ;;  %v953_v6 = vld [vmem:[%s1380_s3] sm:$0xff]  ;;  %s656_s10 = sshll.u32 %s342_s27, 4  ;;  %s658_s11 = sshll.u32 %s655_s25, 4  ;;  %s657_s10 = int_to_ptr.vmem [resolvable:$true] %s656_s10  ;;  %s659_s11 = int_to_ptr.hbm [resolvable:$true] %s658_s11 }
  0x34   : > { %v1029_v10 = vld [vmem:[%s359_s15] ss:$0 sm:$0xff]  ;;  %s642_s21 = scalar_lea.sflag [#allocation5], %s1253_s29  ;;  %s1074_s12 = sshra.s32 %s659_s11, 4  ;;  %s1075_s12 = int_to_ptr.hbm [resolvable:$true] %s1074_s12 }
  0x35   : > { %s1076_s28 = scalar_lea.hbm %s1075_s12, 16  ;;  %s1080_s14 = scalar_lea.hbm %s1382_s5, 32 }
  0x36   : > { %491 = vmatpush.bf16.xpose.msra.mxu0 %v871_v21  ;;  %p1077_p6 = scmp.ne.s32.totalorder %s1075_s12, %s1076_s28  ;;  %p1081_p10 = scmp.lt.s32.totalorder %s1075_s12, %s1382_s5 }
  0x37   : > { %505 = vmatpush.bf16.xpose.msra.mxu1 %v875_v22  ;;  %p1082_p13 = scmp.lt.s32.totalorder %s1080_s14, %s1076_s28 }
  0x38   : > { %p1078_p7 = pnand %p1077_p6, %p1230_p9 }
  0x39   : > { %p1083_p0 = por %p1082_p13, %p1081_p10 }
  0x3a   : > { %617 = vmatpush.bf16.xpose.msra.mxu2 %v607_v23  ;;  %p1079_p8 = pneg %p1078_p7 }
  0x3c   : > { %p1084_p1 = pnand %p1083_p0, %p1079_p8 }
  0x3e   : > { %492 = vmatpush.bf16.xpose.msra.mxu0 %v863_v29 }
  0x3f   : > { %506 = vmatpush.bf16.xpose.msra.mxu1 %v867_v30 }
  0x42   : > { %618 = vmatpush.bf16.xpose.msra.mxu2 %v604_v31 }
  0x46   : > { %493 = vmatpush.bf16.xpose.msra.mxu0 %v855_v37 }
  0x47   : > { %507 = vmatpush.bf16.xpose.msra.mxu1 %v859_v38 }
  0x4a   : > { %619 = vmatpush.bf16.xpose.msra.mxu2 %v601_v39 }
  0x4e   : > { %494 = vmatpush.bf16.xpose.msra.mxu0 %v847_v45 }
  0x4f   : > { %508 = vmatpush.bf16.xpose.msra.mxu1 %v851_v46 }
  0x52   : > { %620 = vmatpush.bf16.xpose.msra.mxu2 %v598_v47 }
  0x56   : > { %495 = vmatpush.bf16.xpose.msra.mxu0 %v839_v53 }
  0x57   : > { %509 = vmatpush.bf16.xpose.msra.mxu1 %v843_v54 }
  0x5a   : > { %621 = vmatpush.bf16.xpose.msra.mxu2 %v595_v55 }
  0x5e   : > { %496 = vmatpush.bf16.xpose.msra.mxu0 %v831_v61 }
  0x5f   : > { %510 = vmatpush.bf16.xpose.msra.mxu1 %v835_v62 }
  0x62   : > { %622 = vmatpush.bf16.xpose.msra.mxu2 %v592_v63 }
  0x65   : > { %497 = vmatmul.bf16.vlgmr.msra.gmra.mxu0 %v823_v4 }
  0x66   : > { %511 = vmatmul.bf16.vlgmr.msra.gmra.mxu1 %v827_v5 }
  0x69   : > { %928 = vmatmul.msk.bf16.vlgmr.msra.gmra.mxu2 %vm587_vm0, %v953_v6 }
  0xe2   : > { %v498_v7 = vpop.f32.mrf.mxu0 }
  0xe3   : > { %v512_v8 = vpop.f32.mrf.mxu1 }
  0xe4   : > { %v513_v9 = vadd.f32 %v512_v8, %v498_v7 }
  0xea   : > { %v500_v14 = vpop.f32.mrf.mxu0 }
  0xeb   : > { %v514_v15 = vpop.f32.mrf.mxu1 }
  0xec   : > { %v624_v11 = vpop.f32.mrf.mxu2  ;;  %v515_v16 = vadd.f32 %v514_v15, %v500_v14 }
  0xed   : > { %v631_v12 = vadd.f32 %v624_v11, %v513_v9 }
  0xef   : > { %v637_v13 = vadd.f32 %v1029_v10, %v631_v12 }
  0xf1   : > { %639 = vst [vmem:[%s342_s27] sm:$0xff] %v637_v13 }
  0xf4   : > { %v626_v17 = vpop.f32.mrf.mxu2 }
  0xf5   : > { %v632_v18 = vadd.f32 %v626_v17, %v515_v16 }
  0xf7   : > { %v638_v19 = vadd.f32 %v1029_v10, %v632_v18 }
  0xf9   : > { %640 = vst [vmem:[%s342_s27 + $0x8] sm:$0xff] %v638_v19 }
  0xfa   : > { %1087 = shalt.err (!%p1084_p1)
}
  0xfb   : > { %s1146_s29 = smov 128   ;;  %s1147_s16 = smov 256  }
  0xfc   : > { %s1148_s17 = smov 8  }
  0xfd   : > { %964 = dma.vmem_to_hbm [thread:$0]  (%p1230_p9), %s657_s10, 256, %s659_s11, %s642_s21, %s1146_s29, %s1147_s16, %s1148_s17  }
  0xfe PF: > { %s673_s24 = sand.u32 1, %s1122_s18   ;;  %p971_p2 = pnand %p810_p12, %p1237_p11 }
  0xff   : > { %s674_s25 = scalar_lea.sflag [#allocation5], %s673_s24 }
 0x100   : > { %p972_p3 = pneg %p971_p2 }
 0x102   : > { %1117 = dma.done.wait (%p972_p3), %s674_s25, 256  }
 0x103   : > { %1119 = vsyncadd (%p972_p3), %s674_s25, 4294967040  ;;  %s21_s23 = sadd.s32 1, %s1142_s23   ;;  %s1387_s18 = smov %s1126_s19 }
 0x104   : > { %p18_p4 = scmp.ge.s32.totalorder %s21_s23, 4   ;;  %s1388_s19 = smov %s1130_s20 }
 0x105   : > { %s1389_s20 = smov %s1235_s7  ;;  %s1390_s21 = smov %s1138_s22 }
 0x106   : > { %s1391_s22 = smov %s1393_s26  ;;  %20 = sbr.rel (!%p18_p4) target bundleno = 6 (0x6), region = 105 }
 0x10b   :  { %680 = vsyncpa [#allocation4], 1 }
 0x10c   :  { %682 = vsyncpa [#allocation4 + $0x1], 1 }
 0x10d   :  { %683 = vsyncpa [#allocation5], 1 }
 0x10e   :  { %685 = vsyncpa [#allocation5 + $0x1], 1 }

</bundles_post_ra>
